<compile_context>
chip_gen: v5e
topology: v5e:2x2
jax: 0.10.0
libtpu: 0.0.40
codegen_flags: <defaults>
</compile_context>

<pallas_src>
import jax
import jax.numpy as jnp
from jax.experimental import pallas as pl
from jax.experimental.pallas import tpu as pltpu


def _fused_1x1convs_kernel(x_ref, w1_ref, b1_ref, w2_ref, b2_ref, o_ref):
    # x_ref:  (BN, C_in, TM)       spatial tile, channels on sublanes
    # w1_ref: (C_mid, C_in)        b1_ref: (C_mid, 1)
    # w2_ref: (C_blk, C_mid)       b2_ref: (C_blk, 1)   (C_blk = C_out or C_out/2)
    # o_ref:  (BN, C_blk, TM)
    w1 = w1_ref[...]
    b1 = b1_ref[...]
    w2 = w2_ref[...]
    b2 = b2_ref[...]
    # Static (trace-time) unroll over the packed batch images: each image is a
    # plain 2-D MXU matmul chain; no transposes, no batched-dot relayouts.
    for b in range(x_ref.shape[0]):
        x = x_ref[b]                                               # (C_in, TM)
        h = jnp.dot(w1, x, preferred_element_type=jnp.float32)
        h = jnp.maximum(h + b1, 0.0)                               # (C_mid, TM)
        # Cast back to the weight dtype so a bf16 deployment feeds bf16
        # operands to the MXU while keeping f32 accumulate / bias / ReLU
        # (no-op for f32).
        y = jnp.dot(w2, h.astype(w2.dtype),
                    preferred_element_type=jnp.float32)
        y = jnp.maximum(y + b2, 0.0)                               # (C_blk, TM)
        o_ref[b] = y.astype(o_ref.dtype)


def fused_conv_relu_conv_relu(x_nchw, w1, b1, w2, b2, *, tm=2048,
                              compute_dtype=None):
    """x_nchw: (N, C_in, H, W); w1: (C_mid, C_in, 1, 1); b1: (C_mid,);
    w2: (C_out, C_mid, 1, 1); b2: (C_out,).  Returns (N, C_out, H, W).

    compute_dtype: optional dtype (e.g. jnp.bfloat16) for activations/weights;
    accumulation, bias and ReLU stay in f32; output keeps the input dtype.
    """
    N, C_in, H, W = x_nchw.shape
    C_mid = w1.shape[0]
    C_out = w2.shape[0]
    HW = H * W
    out_dtype = x_nchw.dtype

    # All zero-copy reshapes -- no transposes, no extra HBM traffic.
    x_cm = x_nchw.reshape(N, C_in, HW)
    w1_mat = w1.reshape(C_mid, C_in)
    w2_mat = w2.reshape(C_out, C_mid)
    b1_col = b1.reshape(C_mid, 1).astype(jnp.float32)
    b2_col = b2.reshape(C_out, 1).astype(jnp.float32)

    if compute_dtype is not None:
        x_cm = x_cm.astype(compute_dtype)
        w1_mat = w1_mat.astype(compute_dtype)
        w2_mat = w2_mat.astype(compute_dtype)

    itemsize = jnp.dtype(x_cm.dtype).itemsize

    # ---- Tile selection ------------------------------------------------------
    # Double-buffered X + O bytes per lane column; cap the spatial tile so the
    # pipelined working set stays within ~20 MiB (safe on v7x's 64 MiB physical
    # / 32 MiB scoped default, and on v5e/v6e).
    bytes_per_col = 2 * (C_in + C_out) * itemsize
    vmem_budget = 20 * 1024 * 1024
    max_block_m = max(128, ((vmem_budget // bytes_per_col) // 128) * 128)
    tm_eff = max(128, min(tm, max_block_m))

    if HW <= tm_eff:
        # Small feature map: one spatial block; pack several batch images per
        # grid step to amortize per-step overhead (BN must divide N so every
        # block is full).
        block_m = HW
        grid_m = 1
        max_bn = max(1, tm_eff // max(HW, 1))
        bn = 1
        for cand in range(min(N, max_bn), 0, -1):
            if N % cand == 0:
                bn = cand
                break
    else:
        # Large feature map: 128-aligned lane tile pipelined over HW (partial
        # last block handled by Pallas: padded lanes are independent matmul
        # columns and masked on store).
        block_m = tm_eff
        grid_m = pl.cdiv(HW, block_m)
        bn = 1
    grid_n = N // bn

    # v7x has 2 TensorCores: if the grid would otherwise be a single step,
    # split the output channels into two halves along an extra parallel axis
    # so both cores get work.  (On 1-TC chips this only adds one tiny step.)
    if grid_n * grid_m == 1 and C_out % 16 == 0:
        grid_c = 2
        c_blk = C_out // 2
    else:
        grid_c = 1
        c_blk = C_out

    # ---- Cost / VMEM hints ---------------------------------------------------
    flops = 2 * N * HW * C_mid * (C_in + C_out)
    bytes_accessed = itemsize * (
        N * C_in * HW + C_mid * C_in + C_out * C_mid
        + N * C_out * HW) + 4 * (C_mid + C_out)

    x_blk_bytes = bn * C_in * block_m * itemsize
    o_blk_bytes = bn * c_blk * block_m * jnp.dtype(out_dtype).itemsize
    w_bytes = (C_mid * C_in + C_out * C_mid) * itemsize + 4 * (C_mid + C_out)
    vmem_need = 2 * (x_blk_bytes + o_blk_bytes + w_bytes)
    vmem_limit = int(min(max(vmem_need + (8 << 20), 32 << 20), 48 << 20))

    out_cm = pl.pallas_call(
        _fused_1x1convs_kernel,
        out_shape=jax.ShapeDtypeStruct((N, C_out, HW), out_dtype),
        grid_spec=pltpu.PrefetchScalarGridSpec(
            num_scalar_prefetch=0,
            grid=(grid_n, grid_m, grid_c),
            in_specs=[
                pl.BlockSpec((bn, C_in, block_m), lambda n, m, c: (n, 0, m)),
                pl.BlockSpec((C_mid, C_in), lambda n, m, c: (0, 0)),
                pl.BlockSpec((C_mid, 1), lambda n, m, c: (0, 0)),
                pl.BlockSpec((c_blk, C_mid), lambda n, m, c: (c, 0)),
                pl.BlockSpec((c_blk, 1), lambda n, m, c: (c, 0)),
            ],
            out_specs=pl.BlockSpec((bn, c_blk, block_m),
                                   lambda n, m, c: (n, c, m)),
        ),
        compiler_params=pltpu.CompilerParams(
            dimension_semantics=("parallel", "parallel", "parallel"),
            vmem_limit_bytes=vmem_limit),
        cost_estimate=pl.CostEstimate(
            flops=flops, transcendentals=0, bytes_accessed=bytes_accessed),
    )(x_cm, w1_mat, b1_col, w2_mat, b2_col)

    # (N, C_out, HW) -> NCHW, zero-copy.
    return out_cm.reshape(N, C_out, H, W)


def _reference(x, w1, b1, w2, b2):
    N, C_in, H, W = x.shape
    C_mid = w1.shape[0]
    C_out = w2.shape[0]
    x_cm = x.reshape(N, C_in, H * W)
    h = jnp.maximum(
        jnp.einsum("oc,ncm->nom", w1.reshape(C_mid, C_in), x_cm)
        + b1.reshape(1, C_mid, 1), 0.0)
    y = jnp.maximum(
        jnp.einsum("oc,ncm->nom", w2.reshape(C_out, C_mid), h)
        + b2.reshape(1, C_out, 1), 0.0)
    return y.reshape(N, C_out, H, W)


if __name__ == "__main__":
    key = jax.random.PRNGKey(0)
    k_x, k_w1, k_b1, k_w2, k_b2, k_x2 = jax.random.split(key, 6)

    # Shapes from the PyTorch module: Conv2d(384->48, 1x1) -> ReLU ->
    # Conv2d(48->192, 1x1) -> ReLU on a (1, 384, 13, 13) input.
    N, C_in, H, W = 1, 384, 13, 13
    C_mid, C_out = 48, 192

    x = jax.random.normal(k_x, (N, C_in, H, W), dtype=jnp.float32)

    # PyTorch Conv2d default init: U(-k, k) with k = 1/sqrt(fan_in).
    k1 = 1.0 / jnp.sqrt(jnp.float32(C_in))
    k2 = 1.0 / jnp.sqrt(jnp.float32(C_mid))
    w1 = jax.random.uniform(k_w1, (C_mid, C_in, 1, 1), jnp.float32, -k1, k1)
    b1 = jax.random.uniform(k_b1, (C_mid,), jnp.float32, -k1, k1)
    w2 = jax.random.uniform(k_w2, (C_out, C_mid, 1, 1), jnp.float32, -k2, k2)
    b2 = jax.random.uniform(k_b2, (C_out,), jnp.float32, -k2, k2)

    fused = jax.jit(fused_conv_relu_conv_relu)

    # Primary check: the module's own shape (exercises the C_out split path).
    out = jax.block_until_ready(fused(x, w1, b1, w2, b2))
    ref = _reference(x, w1, b1, w2, b2)
    assert out.shape == (N, C_out, H, W)
    assert jnp.allclose(out, ref, atol=1e-4, rtol=1e-4)

    # Secondary check: small multi-image batch (exercises batch packing).
    x_b = jax.random.normal(k_x2, (3, C_in, H, W), dtype=jnp.float32)
    out_b = jax.block_until_ready(fused(x_b, w1, b1, w2, b2))
    ref_b = _reference(x_b, w1, b1, w2, b2)
    assert out_b.shape == (3, C_out, H, W)
    assert jnp.allclose(out_b, ref_b, atol=1e-4, rtol=1e-4)

    print("KERNEL_OK")
</pallas_src>

<mosaic_0001>
module attributes {stable_mosaic.version = 11 : i64} {
  func.func @_fused_1x1convs_kernel(%arg0: i32, %arg1: i32, %arg2: i32, %arg3: memref<1x384x169xf32, #tpu.memory_space<vmem>>, %arg4: memref<48x384xf32, #tpu.memory_space<vmem>>, %arg5: memref<48x1xf32, #tpu.memory_space<vmem>>, %arg6: memref<96x48xf32, #tpu.memory_space<vmem>>, %arg7: memref<96x1xf32, #tpu.memory_space<vmem>>, %arg8: memref<1x96x169xf32, #tpu.memory_space<vmem>>) attributes {dimension_semantics = [#tpu.dimension_semantics<parallel>, #tpu.dimension_semantics<parallel>, #tpu.dimension_semantics<parallel>], iteration_bounds = array<i64: 1, 1, 2>, scalar_prefetch = 0 : i64, scratch_operands = 0 : i64, tpu.core_type = #tpu.core_type<tc>, window_params = [{transform_indices = @transform_0, window_bounds = array<i64: 1, 384, 169>}, {pipeline_mode = #tpu.pipeline_mode<synchronous>, transform_indices = @transform_1, window_bounds = array<i64: 48, 384>}, {pipeline_mode = #tpu.pipeline_mode<synchronous>, transform_indices = @transform_2, window_bounds = array<i64: 48, 1>}, {transform_indices = @transform_3, window_bounds = array<i64: 96, 48>}, {transform_indices = @transform_4, window_bounds = array<i64: 96, 1>}, {transform_indices = @transform_5, window_bounds = array<i64: 1, 96, 169>}]} {
    %c0 = arith.constant 0 : index
    %c0_0 = arith.constant 0 : index
    %0 = vector.load %arg4[%c0, %c0_0] : memref<48x384xf32, #tpu.memory_space<vmem>>, vector<48x384xf32>
    %c0_1 = arith.constant 0 : index
    %c0_2 = arith.constant 0 : index
    %1 = vector.load %arg5[%c0_1, %c0_2] : memref<48x1xf32, #tpu.memory_space<vmem>>, vector<48x1xf32>
    %c0_3 = arith.constant 0 : index
    %c0_4 = arith.constant 0 : index
    %2 = vector.load %arg6[%c0_3, %c0_4] : memref<96x48xf32, #tpu.memory_space<vmem>>, vector<96x48xf32>
    %c0_5 = arith.constant 0 : index
    %c0_6 = arith.constant 0 : index
    %3 = vector.load %arg7[%c0_5, %c0_6] : memref<96x1xf32, #tpu.memory_space<vmem>>, vector<96x1xf32>
    %c0_7 = arith.constant 0 : index
    %c0_8 = arith.constant 0 : index
    %c0_9 = arith.constant 0 : index
    %4 = vector.load %arg3[%c0_7, %c0_8, %c0_9] : memref<1x384x169xf32, #tpu.memory_space<vmem>>, vector<1x384x169xf32>
    %5 = vector.shape_cast %4 : vector<1x384x169xf32> to vector<384x169xf32>
    %cst = arith.constant dense<0.000000e+00> : vector<48x169xf32>
    %6 = tpu.matmul %0, %5, %cst {dimension_numbers = #tpu.dot_dimension_numbers<[1], [0], [0], [1], [0, 0, 1, 1], [], []>} : vector<48x384xf32>, vector<384x169xf32>, vector<48x169xf32> -> vector<48x169xf32>
    %7 = vector.broadcast %1 : vector<48x1xf32> to vector<48x169xf32>
    %8 = arith.addf %6, %7 : vector<48x169xf32>
    %cst_10 = arith.constant 0.000000e+00 : f32
    %9 = vector.broadcast %cst_10 : f32 to vector<48x169xf32>
    %10 = arith.maximumf %8, %9 : vector<48x169xf32>
    %cst_11 = arith.constant dense<0.000000e+00> : vector<96x169xf32>
    %11 = tpu.matmul %2, %10, %cst_11 {dimension_numbers = #tpu.dot_dimension_numbers<[1], [0], [0], [1], [0, 0, 1, 1], [], []>} : vector<96x48xf32>, vector<48x169xf32>, vector<96x169xf32> -> vector<96x169xf32>
    %12 = vector.broadcast %3 : vector<96x1xf32> to vector<96x169xf32>
    %13 = arith.addf %11, %12 : vector<96x169xf32>
    %cst_12 = arith.constant 0.000000e+00 : f32
    %14 = vector.broadcast %cst_12 : f32 to vector<96x169xf32>
    %15 = arith.maximumf %13, %14 : vector<96x169xf32>
    %c0_13 = arith.constant 0 : index
    %c0_14 = arith.constant 0 : index
    %c0_15 = arith.constant 0 : index
    %16 = vector.load %arg8[%c0_13, %c0_14, %c0_15] : memref<1x96x169xf32, #tpu.memory_space<vmem>>, vector<1x96x169xf32>
    %17 = vector.shape_cast %16 : vector<1x96x169xf32> to vector<96x169xf32>
    %18 = vector.shape_cast %15 : vector<96x169xf32> to vector<1x96x169xf32>
    tpu.vector_store %arg8[%c0_13, %c0_14, %c0_15], %18 {strides = array<i32>} : memref<1x96x169xf32, #tpu.memory_space<vmem>>, vector<1x96x169xf32>,
    return
  }
  func.func @transform_0(%arg0: i32, %arg1: i32, %arg2: i32) -> (i32, i32, i32) {
    %c0_i32 = arith.constant 0 : i32
    %c0_i32_0 = arith.constant 0 : i32
    return %arg0, %c0_i32, %arg1 : i32, i32, i32
  }
  func.func @transform_1(%arg0: i32, %arg1: i32, %arg2: i32) -> (i32, i32) {
    %c0_i32 = arith.constant 0 : i32
    %c0_i32_0 = arith.constant 0 : i32
    %c0_i32_1 = arith.constant 0 : i32
    return %c0_i32, %c0_i32_0 : i32, i32
  }
  func.func @transform_2(%arg0: i32, %arg1: i32, %arg2: i32) -> (i32, i32) {
    %c0_i32 = arith.constant 0 : i32
    %c0_i32_0 = arith.constant 0 : i32
    %c0_i32_1 = arith.constant 0 : i32
    return %c0_i32, %c0_i32_0 : i32, i32
  }
  func.func @transform_3(%arg0: i32, %arg1: i32, %arg2: i32) -> (i32, i32) {
    %c0_i32 = arith.constant 0 : i32
    %c0_i32_0 = arith.constant 0 : i32
    return %arg2, %c0_i32 : i32, i32
  }
  func.func @transform_4(%arg0: i32, %arg1: i32, %arg2: i32) -> (i32, i32) {
    %c0_i32 = arith.constant 0 : i32
    %c0_i32_0 = arith.constant 0 : i32
    return %arg2, %c0_i32 : i32, i32
  }
  func.func @transform_5(%arg0: i32, %arg1: i32, %arg2: i32) -> (i32, i32, i32) {
    %c0_i32 = arith.constant 0 : i32
    return %arg0, %arg2, %arg1 : i32, i32, i32
  }
}

</mosaic_0001>

<bundles_post_ra>
// kernel: fused_conv_relu_conv_relu.1
= control target key start
LH: loop header
LB: loop body
LE: loop exit
PB: predicated region body
PF: predicated region fallthrough
CT: control target
= control target key end

     0   :  { %s1244_s18 = smov 0   ;;  %s1246_s19 = smov 0   ;;  %s1843_s0 = inlined_call_operand.vmem [shape: f32[1,384,169], index: 0, kind: input, shape index: {}]   ;;  %s1844_s1 = inlined_call_operand.vmem [shape: f32[48,384], index: 1, kind: input, shape index: {}]   ;;  %s1845_s2 = inlined_call_operand.vmem [shape: f32[48,1], index: 2, kind: input, shape index: {}]   ;;  %s1846_s3 = inlined_call_operand.vmem [shape: f32[192,48], index: 3, kind: input, shape index: {}]   ;;  %s1847_s4 = inlined_call_operand.vmem [shape: f32[192,1], index: 4, kind: input, shape index: {}]   ;;  %s1848_s5 = inlined_call_operand.vmem [shape: f32[1,192,169], index: 5, kind: output, shape index: {}]  }
   0x1   :  { %s1248_s20 = smov 0  }
   0x2 LB: > { %s27_s21 = sadd.s32 1, %s1207_s19  ;;  %p1117_p0 = scmp.ge.s32.totalorder %s1211_s20, 1  ;;  %s1211_s20 = sphi %s1248_s20, %s15_s20   ;;  %s1207_s19 = sphi %s1246_s19, %s1851_s19   ;;  %s1203_s18 = sphi %s1244_s18, %s1850_s18  }
   0x3   : > { %p28_p1 = scmp.ge.s32.totalorder %s27_s21, 2  ;;  %p239_p2 = scmp.lt.s32.totalorder %s1211_s20, 3 }
   0x5   : > { %s1853_s21 = smov (%p28_p1, %s27_s21), 0  ;;  %p240_p3 = pnand %p1117_p0, %p239_p2 }
   0x6   : > { %s300_s11 = smul.u32 (!%p240_p3), 12, %s1203_s18 }
   0x7   : > { %243 = sbr.rel (%p240_p3) target bundleno = 477 (0x1dd), region = 40 }
   0x8   : > { %p1591_p4 = scmp.lt.s32.totalorder (!%p240_p3), %s300_s11, 23 }
   0xc   : > { %v406_v0 = vld [vmem:[%s1843_s0 + $0xf0] sm:$0xff]  ;;  %v404_v2 = vld [vmem:[%s1843_s0 + $0xe0] sm:$0xff]  ;;  %v407_v30 = vld [vmem:[%s1843_s0 + $0xf8] sm:$0xff]  ;;  %v1213_v53 = vmov 0   ;;  %s1855_s11 = smov (!%p1591_p4, %s300_s11), 23  ;;  %vm784_vm0 = vcmask 392192  }
   0xd   : > { %v470_v1 = vld [vmem:[%s1843_s0 + $0x2f0] sm:$0xff]  ;;  %502 = vmatpush.msra.mxu0 %v406_v0  ;;  %v468_v4 = vld [vmem:[%s1843_s0 + $0x2e0] sm:$0xff]  ;;  %607 = vmatpush.msra.mxu3 %v407_v30  ;;  %v405_v33 = vld [vmem:[%s1843_s0 + $0xe8] sm:$0xff]  ;;  %s1118_s9 = sshll.u32 %s1855_s11, 3  ;;  %vm952_vm1 = vcmask 334848  }
   0xe   : > { %572 = vmatpush.msra.mxu2 %v470_v1  ;;  %v438_v3 = vld [vmem:[%s1843_s0 + $0x1f0] sm:$0xff]  ;;  %v436_v6 = vld [vmem:[%s1843_s0 + $0x1e0] sm:$0xff]  ;;  %v403_v35 = vld [vmem:[%s1843_s0 + $0xd8] sm:$0xff]  ;;  %1187 = vset.pattern.permute.xlu1 %v1213_v53  ;;  %s1665_s27 = scalar_lea.vmem %s1847_s4, %s1118_s9  ;;  %s1736_s16 = scalar_lea.vmem %s1846_s3, %s1118_s9 }
   0xf   : > { %537 = vmatpush.msra.mxu1 %v438_v3  ;;  %v402_v5 = vld [vmem:[%s1843_s0 + $0xd0] sm:$0xff]  ;;  %503 = vmatpush.msra.mxu0 %v404_v2  ;;  %v400_v9 = vld [vmem:[%s1843_s0 + $0xc0] sm:$0xff]  ;;  %v401_v39 = vld [vmem:[%s1843_s0 + $0xc8] sm:$0xff]  ;;  %s1148_s9 = sshll.u32 %s1855_s11, 4 }
  0x10   : > { %v466_v7 = vld [vmem:[%s1843_s0 + $0x2d0] sm:$0xff]  ;;  %573 = vmatpush.msra.mxu2 %v468_v4  ;;  %v464_v10 = vld [vmem:[%s1843_s0 + $0x2c0] sm:$0xff]  ;;  %608 = vmatpush.msra.mxu3 %v405_v33  ;;  %v399_v43 = vld [vmem:[%s1843_s0 + $0xb8] sm:$0xff]  ;;  %s1796_s23 = scalar_lea.vmem %s1848_s5, %s1148_s9 }
  0x11   : > { %v434_v8 = vld [vmem:[%s1843_s0 + $0x1d0] sm:$0xff]  ;;  %538 = vmatpush.msra.mxu1 %v436_v6  ;;  %504 = vmatpush.msra.mxu0 %v402_v5  ;;  %v432_v11 = vld [vmem:[%s1843_s0 + $0x1c0] sm:$0xff]  ;;  %v397_v50 = vld [vmem:[%s1843_s0 + $0xa8] sm:$0xff] }
  0x12   : > { %574 = vmatpush.msra.mxu2 %v466_v7  ;;  %v398_v12 = vld [vmem:[%s1843_s0 + $0xb0] sm:$0xff]  ;;  %v396_v15 = vld [vmem:[%s1843_s0 + $0xa0] sm:$0xff]  ;;  %609 = vmatpush.msra.mxu3 %v403_v35  ;;  %v439_v57 = vld [vmem:[%s1843_s0 + $0x1f8] sm:$0xff] }
  0x13   : > { %539 = vmatpush.msra.mxu1 %v434_v8  ;;  %v462_v13 = vld [vmem:[%s1843_s0 + $0x2b0] sm:$0xff]  ;;  %505 = vmatpush.msra.mxu0 %v400_v9  ;;  %v460_v16 = vld [vmem:[%s1843_s0 + $0x2a0] sm:$0xff]  ;;  %v1442_v58 = vld [vmem:[%s1844_s1 + $0x8] sm:$0xff] }
  0x14   : > { %575 = vmatpush.msra.mxu2 %v464_v10  ;;  %v430_v14 = vld [vmem:[%s1843_s0 + $0x1b0] sm:$0xff]  ;;  %v428_v17 = vld [vmem:[%s1843_s0 + $0x1a0] sm:$0xff]  ;;  %610 = vmatpush.msra.mxu3 %v401_v39  ;;  %v349_v59 = vld [vmem:[%s1845_s2 + $0x18] sm:$0xff] }
  0x15   : > { %540 = vmatpush.msra.mxu1 %v432_v11  ;;  %506 = vmatpush.msra.mxu0 %v398_v12  ;;  %v394_v18 = vld [vmem:[%s1843_s0 + $0x90] sm:$0xff]  ;;  %v392_v21 = vld [vmem:[%s1843_s0 + $0x80] sm:$0xff]  ;;  %v437_v60 = vld [vmem:[%s1843_s0 + $0x1e8] sm:$0xff] }
  0x16   : > { %576 = vmatpush.msra.mxu2 %v462_v13  ;;  %v458_v19 = vld [vmem:[%s1843_s0 + $0x290] sm:$0xff]  ;;  %v456_v22 = vld [vmem:[%s1843_s0 + $0x280] sm:$0xff]  ;;  %611 = vmatpush.msra.mxu3 %v399_v43  ;;  %v471_v61 = vld [vmem:[%s1843_s0 + $0x2f8] sm:$0xff] }
  0x17   : > { %541 = vmatpush.msra.mxu1 %v430_v14  ;;  %507 = vmatpush.msra.mxu0 %v396_v15  ;;  %v426_v20 = vld [vmem:[%s1843_s0 + $0x190] sm:$0xff]  ;;  %v424_v23 = vld [vmem:[%s1843_s0 + $0x180] sm:$0xff]  ;;  %v395_v62 = vld [vmem:[%s1843_s0 + $0x98] sm:$0xff] }
  0x18   : > { %577 = vmatpush.msra.mxu2 %v460_v16  ;;  %v390_v24 = vld [vmem:[%s1843_s0 + $0x70] sm:$0xff]  ;;  %v388_v27 = vld [vmem:[%s1843_s0 + $0x60] sm:$0xff]  ;;  %612 = vmatpush.msra.mxu3 %v397_v50  ;;  %v435_v63 = vld [vmem:[%s1843_s0 + $0x1d8] sm:$0xff] }
  0x19   : > { %542 = vmatpush.msra.mxu1 %v428_v17  ;;  %508 = vmatpush.msra.mxu0 %v394_v18  ;;  %v454_v25 = vld [vmem:[%s1843_s0 + $0x270] sm:$0xff]  ;;  %v452_v28 = vld [vmem:[%s1843_s0 + $0x260] sm:$0xff]  ;;  %v469_v0 = vld [vmem:[%s1843_s0 + $0x2e8] sm:$0xff] }
  0x1a   : > { %578 = vmatpush.msra.mxu2 %v458_v19  ;;  %v422_v26 = vld [vmem:[%s1843_s0 + $0x170] sm:$0xff]  ;;  %v420_v29 = vld [vmem:[%s1843_s0 + $0x160] sm:$0xff]  ;;  %489 = vperm.xlu1 %1187, %v349_v59   ;;  %v393_v1 = vld [vmem:[%s1843_s0 + $0x88] sm:$0xff] }
  0x1b   : > { %543 = vmatpush.msra.mxu1 %v426_v20  ;;  %509 = vmatpush.msra.mxu0 %v392_v21  ;;  %v386_v31 = vld [vmem:[%s1843_s0 + $0x50] sm:$0xff]  ;;  %v384_v36 = vld [vmem:[%s1843_s0 + $0x40] sm:$0xff]  ;;  %v347_v2 = vld [vmem:[%s1845_s2 + $0x8] sm:$0xff] }
  0x1c   : > { %579 = vmatpush.msra.mxu2 %v456_v22  ;;  %v450_v32 = vld [vmem:[%s1843_s0 + $0x250] sm:$0xff]  ;;  %v448_v37 = vld [vmem:[%s1843_s0 + $0x240] sm:$0xff]  ;;  %613 = vmatpush.msra.mxu3 %v395_v62  ;;  %v433_v3 = vld [vmem:[%s1843_s0 + $0x1c8] sm:$0xff] }
  0x1d   : > { %544 = vmatpush.msra.mxu1 %v424_v23  ;;  %510 = vmatpush.msra.mxu0 %v390_v24  ;;  %v418_v34 = vld [vmem:[%s1843_s0 + $0x150] sm:$0xff]  ;;  %v416_v38 = vld [vmem:[%s1843_s0 + $0x140] sm:$0xff]  ;;  %v467_v4 = vld [vmem:[%s1843_s0 + $0x2d8] sm:$0xff] }
  0x1e   : > { %580 = vmatpush.msra.mxu2 %v454_v25  ;;  %v382_v40 = vld [vmem:[%s1843_s0 + $0x30] sm:$0xff]  ;;  %v380_v44 = vld [vmem:[%s1843_s0 + $0x20] sm:$0xff]  ;;  %1188 = vset.pattern.permute.xlu2 %v1213_v53  ;;  %v1480_v5 = vld [vmem:[%s1844_s1 + $0x18] sm:$0xff] }
  0x1f   : > { %545 = vmatpush.msra.mxu1 %v422_v26  ;;  %511 = vmatpush.msra.mxu0 %v388_v27  ;;  %v446_v41 = vld [vmem:[%s1843_s0 + $0x230] sm:$0xff]  ;;  %v444_v45 = vld [vmem:[%s1843_s0 + $0x220] sm:$0xff]  ;;  %v1485_v6 = vld [vmem:[%s1844_s1 + $0x28] sm:$0xff] }
  0x20   : > { %581 = vmatpush.msra.mxu2 %v452_v28  ;;  %v414_v42 = vld [vmem:[%s1843_s0 + $0x130] sm:$0xff]  ;;  %v412_v46 = vld [vmem:[%s1843_s0 + $0x120] sm:$0xff]  ;;  %614 = vmatpush.msra.mxu3 %v393_v1  ;;  %v391_v7 = vld [vmem:[%s1843_s0 + $0x78] sm:$0xff] }
  0x21   : > { %546 = vmatpush.msra.mxu1 %v420_v29  ;;  %512 = vmatpush.msra.mxu0 %v386_v31  ;;  %v378_v47 = vld [vmem:[%s1843_s0 + $0x10] sm:$0xff]  ;;  %v376_v51 = vld [vmem:[%s1843_s0] sm:$0xff]  ;;  %v431_v8 = vld [vmem:[%s1843_s0 + $0x1b8] sm:$0xff] }
  0x22   : > { %582 = vmatpush.msra.mxu2 %v450_v32  ;;  %v442_v48 = vld [vmem:[%s1843_s0 + $0x210] sm:$0xff]  ;;  %v440_v52 = vld [vmem:[%s1843_s0 + $0x200] sm:$0xff]  ;;  %479 = vperm.xlu2 %1188, %v347_v2   ;;  %v465_v11 = vld [vmem:[%s1843_s0 + $0x2c8] sm:$0xff] }
  0x23   : > { %547 = vmatpush.msra.mxu1 %v418_v34  ;;  %513 = vmatpush.msra.mxu0 %v384_v36  ;;  %v410_v49 = vld [vmem:[%s1843_s0 + $0x110] sm:$0xff]  ;;  %v1426_v54 = vld [vmem:[%s1844_s1] sm:$0xff]  ;;  %v389_v12 = vld [vmem:[%s1843_s0 + $0x68] sm:$0xff] }
  0x24   : > { %583 = vmatpush.msra.mxu2 %v448_v37  ;;  %v1431_v55 = vld [vmem:[%s1844_s1 + $0x10] sm:$0xff]  ;;  %v408_v56 = vld [vmem:[%s1843_s0 + $0x100] sm:$0xff]  ;;  %615 = vmatpush.msra.mxu3 %v391_v7  ;;  %v429_v13 = vld [vmem:[%s1843_s0 + $0x1a8] sm:$0xff] }
  0x25   : > { %548 = vmatpush.msra.mxu1 %v416_v38  ;;  %514 = vmatpush.msra.mxu0 %v382_v40  ;;  %v1496_v9 = vld [vmem:[%s1844_s1 + $0x20] sm:$0xff]  ;;  %v348_v10 = vld [vmem:[%s1845_s2 + $0x10] sm:$0xff]  ;;  %v463_v14 = vld [vmem:[%s1843_s0 + $0x2b8] sm:$0xff] }
  0x26   : > { %584 = vmatpush.msra.mxu2 %v446_v41  ;;  %484 = vperm.xlu1 %1187, %v348_v10   ;;  %v387_v15 = vld [vmem:[%s1843_s0 + $0x58] sm:$0xff]  ;;  %v351_v17 = vld [vmem:[%s1845_s2 + $0x28] sm:$0xff]  ;;  %v1534_v20 = vld [vmem:[%s1844_s1 + $0x30] sm:$0xff] }
  0x27   : > { %549 = vmatpush.msra.mxu1 %v414_v42  ;;  %515 = vmatpush.msra.mxu0 %v380_v44  ;;  %v427_v16 = vld [vmem:[%s1843_s0 + $0x198] sm:$0xff]  ;;  %v461_v18 = vld [vmem:[%s1843_s0 + $0x2a8] sm:$0xff]  ;;  %v1539_v21 = vld [vmem:[%s1844_s1 + $0x40] sm:$0xff] }
  0x28   : > { %585 = vmatpush.msra.mxu2 %v444_v45  ;;  %616 = vmatpush.msra.mxu3 %v389_v12  ;;  %v385_v19 = vld [vmem:[%s1843_s0 + $0x48] sm:$0xff]  ;;  %v459_v23 = vld [vmem:[%s1843_s0 + $0x298] sm:$0xff]  ;;  %v346_v29 = vld [vmem:[%s1845_s2] sm:$0xff] }
  0x29   : > { %550 = vmatpush.msra.mxu1 %v412_v46  ;;  %516 = vmatpush.msra.mxu0 %v378_v47  ;;  %v425_v22 = vld [vmem:[%s1843_s0 + $0x188] sm:$0xff]  ;;  %v1550_v24 = vld [vmem:[%s1844_s1 + $0x38] sm:$0xff]  ;;  %v350_v33 = vld [vmem:[%s1845_s2 + $0x20] sm:$0xff] }
  0x2a   : > { %586 = vmatpush.msra.mxu2 %v442_v48  ;;  %1186 = vset.pattern.permute.xlu0 %v1213_v53  ;;  %v383_v25 = vld [vmem:[%s1843_s0 + $0x38] sm:$0xff]  ;;  %v457_v27 = vld [vmem:[%s1843_s0 + $0x288] sm:$0xff]  ;;  %v1614_v40 = vld [vmem:[%s1844_s1 + $0x50] sm:$0xff] }
  0x2b   : > { %551 = vmatpush.msra.mxu1 %v410_v49  ;;  %517 = vmatpush.msra.mxu0 %v376_v51  ;;  %v423_v26 = vld [vmem:[%s1843_s0 + $0x178] sm:$0xff]  ;;  %v381_v28 = vld [vmem:[%s1843_s0 + $0x28] sm:$0xff]  ;;  %v340_v47 = vld [vmem:[%s1844_s1 + $0x60] sm:$0xff] }
  0x2c   : > { %587 = vmatpush.msra.mxu2 %v440_v52  ;;  %518 = vmatmul.f32.vlgmr.msra.gmra.mxu0 %v1426_v54  ;;  %v421_v30 = vld [vmem:[%s1843_s0 + $0x168] sm:$0xff]  ;;  %v455_v31 = vld [vmem:[%s1843_s0 + $0x278] sm:$0xff]  ;;  %v342_v48 = vld [vmem:[%s1844_s1 + $0x70] sm:$0xff] }
  0x2d   : > { %588 = vmatmul.f32.vlgmr.msra.gmra.mxu2 %v1431_v55  ;;  %552 = vmatpush.msra.mxu1 %v408_v56  ;;  %v379_v32 = vld [vmem:[%s1843_s0 + $0x18] sm:$0xff]  ;;  %v453_v35 = vld [vmem:[%s1843_s0 + $0x268] sm:$0xff]  ;;  %v368_v62 = vld [vmem:[%s1665_s27 + $0x20] sm:$0xff] }
  0x2e   : > { %642 = vmatpush.msrb.mxu0 %v439_v57  ;;  %553 = vmatmul.f32.vlgmr.msra.gmra.mxu1 %v1442_v58  ;;  %v419_v34 = vld [vmem:[%s1843_s0 + $0x158] sm:$0xff]  ;;  %v1598_v36 = vld [vmem:[%s1844_s1 + $0x48] sm:$0xff]  ;;  %v374_v2 = vld [vmem:[%s1665_s27 + $0x50] sm:$0xff] }
  0x2f   : > { %677 = vmatpush.msrb.mxu1 %v471_v61  ;;  %617 = vmatpush.msra.mxu3 %v387_v15  ;;  %v1603_v37 = vld [vmem:[%s1844_s1 + $0x58] sm:$0xff]  ;;  %v377_v38 = vld [vmem:[%s1843_s0 + $0x8] sm:$0xff] }
  0x30   : > { %643 = vmatpush.msrb.mxu0 %v437_v60  ;;  %499 = vperm.xlu0 %1186, %v351_v17   ;;  %v417_v39 = vld [vmem:[%s1843_s0 + $0x148] sm:$0xff]  ;;  %v451_v41 = vld [vmem:[%s1843_s0 + $0x258] sm:$0xff]  ;;  %v344_v60 = vld [vmem:[%s1844_s1 + $0x80] sm:$0xff] }
  0x31   : > { %678 = vmatpush.msrb.mxu1 %v469_v0  ;;  %618 = vmatpush.msra.mxu3 %v385_v19  ;;  %v415_v42 = vld [vmem:[%s1843_s0 + $0x138] sm:$0xff]  ;;  %v449_v43 = vld [vmem:[%s1843_s0 + $0x248] sm:$0xff] }
  0x32   : > { %644 = vmatpush.msrb.mxu0 %v435_v63  ;;  %474 = vperm.xlu2 %1188, %v346_v29   ;;  %v413_v44 = vld [vmem:[%s1843_s0 + $0x128] sm:$0xff]  ;;  %v447_v45 = vld [vmem:[%s1843_s0 + $0x238] sm:$0xff]  ;;  %v370_v63 = vld [vmem:[%s1665_s27 + $0x30] sm:$0xff] }
  0x33   : > { %679 = vmatpush.msrb.mxu1 %v467_v4  ;;  %619 = vmatpush.msra.mxu3 %v383_v25  ;;  %v411_v46 = vld [vmem:[%s1843_s0 + $0x118] sm:$0xff]  ;;  %v445_v49 = vld [vmem:[%s1843_s0 + $0x228] sm:$0xff] }
  0x34   : > { %645 = vmatpush.msrb.mxu0 %v433_v3  ;;  %v409_v50 = vld [vmem:[%s1843_s0 + $0x108] sm:$0xff]  ;;  %v443_v52 = vld [vmem:[%s1843_s0 + $0x218] sm:$0xff]  ;;  %v372_v3 = vld [vmem:[%s1665_s27 + $0x40] sm:$0xff] }
  0x35   : > { %521 = vmatmul.f32.gmra.mxu0 %v1480_v5  ;;  %591 = vmatmul.f32.gmra.mxu2 %v1485_v6  ;;  %v341_v51 = vld [vmem:[%s1844_s1 + $0x68] sm:$0xff]  ;;  %v343_v56 = vld [vmem:[%s1844_s1 + $0x78] sm:$0xff] }
  0x36   : > { %646 = vmatpush.msrb.mxu0 %v431_v8  ;;  %556 = vmatmul.f32.gmra.mxu1 %v1496_v9  ;;  %v441_v53 = vld [vmem:[%s1843_s0 + $0x208] sm:$0xff]  ;;  %v367_v61 = vld [vmem:[%s1665_s27 + $0x18] sm:$0xff] }
  0x37   : > { %680 = vmatpush.msrb.mxu1 %v465_v11  ;;  %620 = vmatpush.msra.mxu3 %v381_v28  ;;  %v345_v57 = vld [vmem:[%s1844_s1 + $0x88] sm:$0xff]  ;;  %v371_v0 = vld [vmem:[%s1665_s27 + $0x38] sm:$0xff] }
  0x38   : > { %647 = vmatpush.msrb.mxu0 %v429_v13  ;;  %494 = vperm.xlu0 %1186, %v350_v33   ;;  %v365_v59 = vld [vmem:[%s1665_s27 + $0x8] sm:$0xff]  ;;  %v375_v4 = vld [vmem:[%s1665_s27 + $0x58] sm:$0xff] }
  0x39   : > { %681 = vmatpush.msrb.mxu1 %v463_v14  ;;  %621 = vmatpush.msra.mxu3 %v379_v32  ;;  %v373_v1 = vld [vmem:[%s1665_s27 + $0x48] sm:$0xff] }
  0x3a   : > { %648 = vmatpush.msrb.mxu0 %v427_v16  ;;  %731 = vperm.xlu1 %1187, %v365_v59  }
  0x3b   : > { %682 = vmatpush.msrb.mxu1 %v461_v18  ;;  %622 = vmatpush.msra.mxu3 %v377_v38 }
  0x3c   : > { %649 = vmatpush.msrb.mxu0 %v425_v22  ;;  %623 = vmatmul.f32.vlgmr.msra.gmra.mxu3 %v1426_v54  ;;  %v364_v54 = vld [vmem:[%s1665_s27] sm:$0xff] }
  0x3d   : > { %524 = vmatmul.f32.gmra.mxu0 %v1534_v20  ;;  %594 = vmatmul.f32.gmra.mxu2 %v1539_v21 }
  0x3e   : > { %683 = vmatpush.msrb.mxu1 %v459_v23  ;;  %650 = vmatpush.msrb.mxu0 %v423_v26 }
  0x3f   : > { %559 = vmatmul.f32.gmra.mxu1 %v1550_v24 }
  0x40   : > { %684 = vmatpush.msrb.mxu1 %v457_v27  ;;  %651 = vmatpush.msrb.mxu0 %v421_v30 }
  0x41   : > { %726 = vperm.xlu0 %1186, %v364_v54  }
  0x42   : > { %685 = vmatpush.msrb.mxu1 %v455_v31  ;;  %652 = vmatpush.msrb.mxu0 %v419_v34 }
  0x43   : > { %746 = vperm.xlu1 %1187, %v368_v62   ;;  %v1739_v62 = vld [vmem:[%s1736_s16] sm:$0xff] }
  0x44   : > { %686 = vmatpush.msrb.mxu1 %v453_v35  ;;  %653 = vmatpush.msrb.mxu0 %v417_v39 }
  0x45   : > { %527 = vmatmul.f32.gmra.mxu0 %v1598_v36  ;;  %597 = vmatmul.f32.gmra.mxu2 %v1603_v37 }
  0x46   : > { %687 = vmatpush.msrb.mxu1 %v451_v41  ;;  %654 = vmatpush.msrb.mxu0 %v415_v42 }
  0x47   : > { %562 = vmatmul.f32.gmra.mxu1 %v1614_v40  ;;  %626 = vmatmul.f32.gmra.mxu3 %v1480_v5 }
  0x48   : > { %688 = vmatpush.msrb.mxu1 %v449_v43  ;;  %655 = vmatpush.msrb.mxu0 %v413_v44 }
  0x49   : > { %741 = vperm.xlu0 %1186, %v367_v61  }
  0x4a   : > { %689 = vmatpush.msrb.mxu1 %v447_v45  ;;  %656 = vmatpush.msrb.mxu0 %v411_v46 }
  0x4b   : > { %761 = vperm.xlu1 %1187, %v371_v0  }
  0x4c   : > { %690 = vmatpush.msrb.mxu1 %v445_v49  ;;  %657 = vmatpush.msrb.mxu0 %v409_v50 }
  0x4d   : > { %530 = vmatmul.f32.gmra.mxu0 %v340_v47  ;;  %600 = vmatmul.f32.gmra.mxu2 %v342_v48 }
  0x4e   : > { %691 = vmatpush.msrb.mxu1 %v443_v52 }
  0x4f   : > { %565 = vmatmul.f32.gmra.mxu1 %v341_v51  ;;  %629 = vmatmul.f32.gmra.mxu3 %v1534_v20 }
  0x50   : > { %692 = vmatpush.msrb.mxu1 %v441_v53 }
  0x51   : > { %756 = vperm.xlu0 %1186, %v370_v63   ;;  %v1742_v63 = vld [vmem:[%s1736_s16 + $0x18] sm:$0xff] }
  0x53   : > { %776 = vperm.xlu1 %1187, %v374_v2  }
  0x55   : > { %533 = vmatmul.f32.gmra.mxu0 %v343_v56  ;;  %603 = vmatmul.f32.gmra.mxu2 %v345_v57 }
  0x57   : > { %568 = vmatmul.f32.gmra.mxu1 %v344_v60  ;;  %632 = vmatmul.f32.gmra.mxu3 %v1598_v36 }
  0x59   : > { %771 = vperm.xlu0 %1186, %v373_v1  }
  0x5d   : > { %658 = vmatmul.f32.vlgmr.msrb.gmra.mxu0 %v1442_v58  ;;  %v369_v58 = vld [vmem:[%s1665_s27 + $0x28] sm:$0xff] }
  0x5f   : > { %693 = vmatmul.f32.vlgmr.msrb.gmra.mxu1 %v1431_v55  ;;  %635 = vmatmul.f32.gmra.mxu3 %v340_v47  ;;  %v366_v55 = vld [vmem:[%s1665_s27 + $0x10] sm:$0xff] }
  0x60   : > { %736 = vperm.xlu2 %1188, %v366_v55   ;;  %v353_v55 = vld [vmem:[%s1736_s16 + $0x8] sm:$0xff] }
  0x65   : > { %661 = vmatmul.f32.gmra.mxu0 %v1496_v9 }
  0x67   : > { %696 = vmatmul.f32.gmra.mxu1 %v1485_v6  ;;  %638 = vmatmul.f32.gmra.mxu3 %v343_v56 }
  0x68   : > { %751 = vperm.xlu2 %1188, %v369_v58   ;;  %v356_v58 = vld [vmem:[%s1736_s16 + $0x20] sm:$0xff] }
  0x6d   : > { %664 = vmatmul.f32.gmra.mxu0 %v1550_v24 }
  0x6f   : > { %699 = vmatmul.f32.gmra.mxu1 %v1539_v21 }
  0x70   : > { %766 = vperm.xlu2 %1188, %v372_v3  }
  0x75   : > { %667 = vmatmul.f32.gmra.mxu0 %v1614_v40 }
  0x77   : > { %702 = vmatmul.f32.gmra.mxu1 %v1603_v37 }
  0x78   : > { %781 = vperm.xlu2 %1188, %v375_v4  }
  0x7c   : > { %v1711_v22 = vpop.permute.xlu2 %479 }
  0x7d   : > { %670 = vmatmul.f32.gmra.mxu0 %v341_v51 }
  0x7f   : > { %705 = vmatmul.f32.gmra.mxu1 %v342_v48 }
  0x85   : > { %673 = vmatmul.f32.gmra.mxu0 %v344_v60 }
  0x87   : > { %708 = vmatmul.f32.gmra.mxu1 %v345_v57 }
  0x8c   : > { %v1707_v18 = vpop.permute.xlu1 %489  ;;  %v1723_v35 = vpop.permute.xlu2 %474 }
  0x98   : > { %v1717_v28 = vpop.permute.xlu1 %484 }
  0xa2   : > { %v1705_v16 = vpop.permute.xlu0 %499 }
  0xa9   : > { %v519_v5 = vpop.f32.mrf.mxu0 }
  0xaa   : > { %v1713_v23 = vpop.permute.xlu0 %494  ;;  %v520_v42 = vadd.f32 %v519_v5, %v1723_v35 }
  0xab   : > { %v554_v6 = vpop.f32.mrf.mxu1 }
  0xac   : > { %v555_v50 = vadd.f32 %v554_v6, %v520_v42  ;;  %v354_v6 = vld [vmem:[%s1736_s16 + $0x10] sm:$0xff]  ;;  %v363_v42 = vld [vmem:[%s1736_s16 + $0x58] sm:$0xff] }
  0xb0   : > { %v589_v7 = vpop.f32.mrf.mxu2 }
  0xb1   : > { %v590_v54 = vadd.f32 %v589_v7, %v555_v50  ;;  %v357_v7 = vld [vmem:[%s1736_s16 + $0x28] sm:$0xff] }
  0xb2   : > { %v522_v8 = vpop.f32.mrf.mxu0 }
  0xb3   : > { %v557_v9 = vpop.f32.mrf.mxu1  ;;  %v523_v37 = vadd.f32 %v522_v8, %v1711_v22  ;;  %v712_v61 = vmax.f32 %v590_v54, 0.0 }
  0xb5   : > { %v558_v47 = vadd.f32 %v557_v9, %v523_v37  ;;  %v360_v37 = vld [vmem:[%s1736_s16 + $0x40] sm:$0xff] }
  0xb8   : > { %v592_v10 = vpop.f32.mrf.mxu2 }
  0xb9   : > { %v593_v51 = vadd.f32 %v592_v10, %v558_v47  ;;  %v732_v47 = vpop.permute.xlu1 %731 }
  0xba   : > { %v525_v11 = vpop.f32.mrf.mxu0 }
  0xbb   : > { %v526_v32 = vadd.f32 %v525_v11, %v1717_v28  ;;  %v714_v59 = vmax.f32 %v593_v51, 0.0  ;;  %v358_v11 = vld [vmem:[%s1736_s16 + $0x30] sm:$0xff] }
  0xbc   : > { %v560_v12 = vpop.f32.mrf.mxu1 }
  0xbd   : > { %v561_v43 = vadd.f32 %v560_v12, %v526_v32 }
  0xbf   : > { %v1709_v21 = vpop.f32.mrf.mxu3 }
  0xc0   : > { %v595_v13 = vpop.f32.mrf.mxu2 }
  0xc1   : > { %v596_v48 = vadd.f32 %v595_v13, %v561_v43  ;;  %v727_v43 = vpop.permute.xlu0 %726 }
  0xc2   : > { %v528_v14 = vpop.f32.mrf.mxu0 }
  0xc3   : > { %v529_v30 = vadd.f32 %v528_v14, %v1707_v18  ;;  %v716_v56 = vmax.f32 %v596_v48, 0.0 }
  0xc4   : > { %v563_v15 = vpop.f32.mrf.mxu1 }
  0xc5   : > { %v564_v38 = vadd.f32 %v563_v15, %v529_v30  ;;  %v359_v30 = vld [vmem:[%s1736_s16 + $0x38] sm:$0xff] }
  0xc8   : > { %v598_v17 = vpop.f32.mrf.mxu2 }
  0xc9   : > { %v599_v44 = vadd.f32 %v598_v17, %v564_v38  ;;  %v742_v48 = vpop.permute.xlu0 %741 }
  0xca   : > { %v531_v19 = vpop.f32.mrf.mxu0  ;;  %v1720_v31 = vpop.f32.mrf.mxu3 }
  0xcb   : > { %v532_v26 = vadd.f32 %v531_v19, %v1713_v23  ;;  %v718_v52 = vmax.f32 %v599_v44, 0.0 }
  0xcc   : > { %v566_v20 = vpop.f32.mrf.mxu1 }
  0xcd   : > { %v567_v33 = vadd.f32 %v566_v20, %v532_v26  ;;  %v628_v20 = vadd.f32 %v1720_v31, %v1711_v22 }
  0xd0   : > { %v601_v24 = vpop.f32.mrf.mxu2 }
  0xd1   : > { %v602_v39 = vadd.f32 %v601_v24, %v567_v33 }
  0xd2   : > { %v534_v25 = vpop.f32.mrf.mxu0  ;;  %v630_v53 = vpop.f32.mrf.mxu3 }
  0xd3   : > { %v535_v27 = vadd.f32 %v534_v25, %v1705_v16  ;;  %v720_v49 = vmax.f32 %v602_v39, 0.0  ;;  %v631_v14 = vadd.f32 %v630_v53, %v1717_v28 }
  0xd4   : > { %v569_v29 = vpop.f32.mrf.mxu1 }
  0xd5   : > { %v570_v34 = vadd.f32 %v569_v29, %v535_v27 }
  0xd8   : > { %v604_v36 = vpop.f32.mrf.mxu2 }
  0xd9   : > { %v605_v40 = vadd.f32 %v604_v36, %v570_v34 }
  0xda   : > { %v1726_v41 = vpop.f32.mrf.mxu0  ;;  %v633_v1 = vpop.f32.mrf.mxu3 }
  0xdb   : > { %v722_v45 = vmax.f32 %v605_v40, 0.0  ;;  %v634_v13 = vadd.f32 %v633_v1, %v1707_v18  ;;  %v361_v40 = vld [vmem:[%s1736_s16 + $0x48] sm:$0xff] }
  0xdc   : > { %v1729_v46 = vpop.f32.mrf.mxu1 }
  0xdd   : > { %831 = vmatpush.msra.mxu0 %v722_v45  ;;  %1149 = vmatpush.msrb.mxu2 %v722_v45 }
  0xdf   : > { %832 = vmatpush.msra.mxu0 %v720_v49  ;;  %1150 = vmatpush.msrb.mxu2 %v720_v49 }
  0xe1   : > { %833 = vmatpush.msra.mxu0 %v718_v52  ;;  %1151 = vmatpush.msrb.mxu2 %v718_v52 }
  0xe2   : > { %v662_v57 = vpop.f32.mrf.mxu0  ;;  %v636_v5 = vpop.f32.mrf.mxu3 }
  0xe3   : > { %834 = vmatpush.msra.mxu0 %v716_v56  ;;  %1152 = vmatpush.msrb.mxu2 %v716_v56  ;;  %v637_v10 = vadd.f32 %v636_v5, %v1713_v23  ;;  %v625_v23 = vadd.f32 %v1709_v21, %v1723_v35  ;;  %v663_v32 = vadd.f32 %v662_v57, %v628_v20  ;;  %v737_v56 = vpop.permute.xlu2 %736  ;;  %v747_v57 = vpop.permute.xlu1 %746 }
  0xe4   : > { %v697_v60 = vpop.f32.mrf.mxu1 }
  0xe5   : > { %835 = vmatpush.msra.mxu0 %v714_v59  ;;  %1153 = vmatpush.msrb.mxu2 %v714_v59  ;;  %v698_v31 = vadd.f32 %v697_v60, %v663_v32 }
  0xe7   : > { %836 = vmatpush.msra.mxu0 %v712_v61  ;;  %1154 = vmatpush.msrb.mxu2 %v712_v61  ;;  %v715_v38 = vmax.f32 %v698_v31, 0.0 }
  0xe8   : > { %1122 = vmatmul.msk.f32.vlgmr.msra.gmra.mxu0 %vm784_vm0, %v1739_v62  ;;  %1125 = vmatmul.msk.f32.vlgmr.msrb.gmra.mxu2 %vm784_vm0, %v1742_v63 }
  0xea   : > { %v665_v0 = vpop.f32.mrf.mxu0  ;;  %v639_v12 = vpop.f32.mrf.mxu3 }
  0xeb   : > { %v640_v17 = vadd.f32 %v639_v12, %v1705_v16  ;;  %v666_v27 = vadd.f32 %v665_v0, %v631_v14  ;;  %v660_v16 = vadd.f32 %v1726_v41, %v625_v23  ;;  %v362_v41 = vld [vmem:[%s1736_s16 + $0x50] sm:$0xff]  ;;  %v752_v1 = vpop.permute.xlu2 %751 }
  0xec   : > { %v700_v2 = vpop.f32.mrf.mxu1 }
  0xed   : > { %v701_v34 = vadd.f32 %v700_v2, %v666_v27  ;;  %v695_v21 = vadd.f32 %v1729_v46, %v660_v16 }
  0xef   : > { %v717_v35 = vmax.f32 %v701_v34, 0.0  ;;  %v713_v39 = vmax.f32 %v695_v21, 0.0 }
  0xf0   : > { %1123 = vmatmul.msk.f32.gmra.mxu0 %vm784_vm0, %v353_v55  ;;  %1126 = vmatmul.msk.f32.gmra.mxu2 %vm784_vm0, %v356_v58 }
  0xf2   : > { %v668_v3 = vpop.f32.mrf.mxu0 }
  0xf3   : > { %v669_v24 = vadd.f32 %v668_v3, %v634_v13  ;;  %v757_v3 = vpop.permute.xlu0 %756  ;;  %v767_v13 = vpop.permute.xlu2 %766 }
  0xf4   : > { %v703_v4 = vpop.f32.mrf.mxu1 }
  0xf5   : > { %v704_v33 = vadd.f32 %v703_v4, %v669_v24 }
  0xf7   : > { %v719_v36 = vmax.f32 %v704_v33, 0.0 }
  0xf8   : > { %1124 = vmatmul.msk.f32.gmra.mxu0 %vm784_vm0, %v354_v6  ;;  %1127 = vmatmul.msk.f32.gmra.mxu2 %vm784_vm0, %v357_v7 }
  0xfa   : > { %v671_v8 = vpop.f32.mrf.mxu0 }
  0xfb   : > { %v672_v15 = vadd.f32 %v671_v8, %v637_v10  ;;  %v772_v27 = vpop.permute.xlu0 %771 }
  0xfc   : > { %v706_v9 = vpop.f32.mrf.mxu1 }
  0xfd   : > { %v707_v29 = vadd.f32 %v706_v9, %v672_v15 }
  0xff   : > { %v721_v22 = vmax.f32 %v707_v29, 0.0 }
 0x100   : > { %1128 = vmatmul.msk.f32.gmra.mxu2 %vm784_vm0, %v358_v11 }
 0x102   : > { %v674_v19 = vpop.f32.mrf.mxu0 }
 0x103   : > { %v675_v25 = vadd.f32 %v674_v19, %v640_v17 }
 0x104   : > { %v709_v26 = vpop.f32.mrf.mxu1 }
 0x105   : > { %v710_v18 = vadd.f32 %v709_v26, %v675_v25 }
 0x107   : > { %v723_v28 = vmax.f32 %v710_v18, 0.0 }
 0x108   : > { %1129 = vmatmul.msk.f32.gmra.mxu2 %vm784_vm0, %v359_v30 }
 0x109   : > { %884 = vmatpush.msra.mxu1 %v723_v28  ;;  %1155 = vmatpush.msrb.mxu3 %v723_v28 }
 0x10b   : > { %885 = vmatpush.msra.mxu1 %v721_v22  ;;  %1156 = vmatpush.msrb.mxu3 %v721_v22 }
 0x10d   : > { %886 = vmatpush.msra.mxu1 %v719_v36  ;;  %1157 = vmatpush.msrb.mxu3 %v719_v36 }
 0x10f   : > { %887 = vmatpush.msra.mxu1 %v717_v35  ;;  %1158 = vmatpush.msrb.mxu3 %v717_v35 }
 0x110   : > { %1130 = vmatmul.msk.f32.gmra.mxu2 %vm784_vm0, %v360_v37 }
 0x111   : > { %888 = vmatpush.msra.mxu1 %v715_v38  ;;  %1159 = vmatpush.msrb.mxu3 %v715_v38 }
 0x113   : > { %889 = vmatpush.msra.mxu1 %v713_v39  ;;  %1160 = vmatpush.msrb.mxu3 %v713_v39 }
 0x114   : > { %1134 = vmatmul.msk.f32.vlgmr.msra.gmra.mxu1 %vm784_vm0, %v1739_v62  ;;  %1137 = vmatmul.msk.f32.vlgmr.msrb.gmra.mxu3 %vm784_vm0, %v1742_v63 }
 0x118   : > { %1131 = vmatmul.msk.f32.gmra.mxu2 %vm784_vm0, %v361_v40 }
 0x11c   : > { %1135 = vmatmul.msk.f32.gmra.mxu1 %vm784_vm0, %v353_v55  ;;  %1138 = vmatmul.msk.f32.gmra.mxu3 %vm784_vm0, %v356_v58 }
 0x120   : > { %1132 = vmatmul.msk.f32.gmra.mxu2 %vm784_vm0, %v362_v41 }
 0x124   : > { %1136 = vmatmul.msk.f32.gmra.mxu1 %vm784_vm0, %v354_v6  ;;  %1139 = vmatmul.msk.f32.gmra.mxu3 %vm784_vm0, %v357_v7  ;;  %v762_v7 = vpop.permute.xlu1 %761 }
 0x128   : > { %1133 = vmatmul.msk.f32.gmra.mxu2 %vm784_vm0, %v363_v42 }
 0x12c   : > { %1140 = vmatmul.msk.f32.gmra.mxu3 %vm784_vm0, %v358_v11  ;;  %v777_v31 = vpop.permute.xlu1 %776 }
 0x134   : > { %1141 = vmatmul.msk.f32.gmra.mxu3 %vm784_vm0, %v359_v30 }
 0x13c   : > { %1142 = vmatmul.msk.f32.gmra.mxu3 %vm784_vm0, %v360_v37 }
 0x144   : > { %1143 = vmatmul.msk.f32.gmra.mxu3 %vm784_vm0, %v361_v40 }
 0x14c   : > { %1144 = vmatmul.msk.f32.gmra.mxu3 %vm784_vm0, %v362_v41  ;;  %v782_v41 = vpop.permute.xlu2 %781 }
 0x154   : > { %1145 = vmatmul.msk.f32.gmra.mxu3 %vm784_vm0, %v363_v42 }
 0x165   : > { %v838_v44 = vpop.f32.mrf.mxu0 }
 0x166   : > { %v839_v45 = vadd.f32 %v838_v44, %v727_v43 }
 0x168   : > { %v927_v46 = vmax.f32 %v839_v45, 0.0 }
 0x16a   : > { %951 = vst [vmem:[%s1796_s23] sm:$0xff] %v927_v46 }
 0x16b   : > { %v847_v49 = vpop.f32.mrf.mxu2 }
 0x16c   : > { %v848_v50 = vadd.f32 %v847_v49, %v742_v48 }
 0x16d   : > { %v841_v51 = vpop.f32.mrf.mxu0 }
 0x16e   : > { %v933_v52 = vmax.f32 %v848_v50, 0.0  ;;  %v842_v53 = vadd.f32 %v841_v51, %v732_v47 }
 0x170   : > { %958 = vst [vmem:[%s1796_s23 + $0x30] sm:$0xff] %v933_v52  ;;  %v929_v54 = vmax.f32 %v842_v53, 0.0 }
 0x172   : > { %954 = vst [vmem:[%s1796_s23 + $0x10] sm:$0xff] %v929_v54 }
 0x173   : > { %v850_v59 = vpop.f32.mrf.mxu2 }
 0x174   : > { %v851_v60 = vadd.f32 %v850_v59, %v747_v57 }
 0x175   : > { %v844_v61 = vpop.f32.mrf.mxu0 }
 0x176   : > { %v935_v62 = vmax.f32 %v851_v60, 0.0  ;;  %v845_v63 = vadd.f32 %v844_v61, %v737_v56 }
 0x178   : > { %960 = vst [vmem:[%s1796_s23 + $0x40] sm:$0xff] %v935_v62  ;;  %v931_v0 = vmax.f32 %v845_v63, 0.0 }
 0x17a   : > { %956 = vst [vmem:[%s1796_s23 + $0x20] sm:$0xff] %v931_v0 }
 0x17b   : > { %v853_v2 = vpop.f32.mrf.mxu2 }
 0x17c   : > { %v854_v55 = vadd.f32 %v853_v2, %v752_v1 }
 0x17e   : > { %v937_v58 = vmax.f32 %v854_v55, 0.0 }
 0x180   : > { %962 = vst [vmem:[%s1796_s23 + $0x50] sm:$0xff] %v937_v58 }
 0x183   : > { %v856_v4 = vpop.f32.mrf.mxu2 }
 0x184   : > { %v857_v5 = vadd.f32 %v856_v4, %v757_v3 }
 0x186   : > { %v939_v6 = vmax.f32 %v857_v5, 0.0 }
 0x188   : > { %964 = vst [vmem:[%s1796_s23 + $0x60] sm:$0xff] %v939_v6 }
 0x18b   : > { %v859_v8 = vpop.f32.mrf.mxu2 }
 0x18c   : > { %v860_v9 = vadd.f32 %v859_v8, %v762_v7 }
 0x18e   : > { %v941_v10 = vmax.f32 %v860_v9, 0.0 }
 0x190   : > { %966 = vst [vmem:[%s1796_s23 + $0x70] sm:$0xff] %v941_v10 }
 0x191   : > { %v891_v11 = vpop.f32.mrf.mxu1 }
 0x192   : > { %v892_v12 = vadd.f32 %v891_v11, %v727_v43 }
 0x193   : > { %v862_v14 = vpop.f32.mrf.mxu2 }
 0x194   : > { %v928_v15 = vmax.f32 %v892_v12, 0.0  ;;  %v863_v17 = vadd.f32 %v862_v14, %v767_v13 }
 0x196   : > { %953 = vst.msk [vmem:[%s1796_s23 + $0x8] sm:$0xff] %vm952_vm1, %v928_v15  ;;  %v943_v19 = vmax.f32 %v863_v17, 0.0 }
 0x197   : > { %v900_v20 = vpop.f32.mrf.mxu3 }
 0x198   : > { %968 = vst [vmem:[%s1796_s23 + $0x80] sm:$0xff] %v943_v19  ;;  %v901_v24 = vadd.f32 %v900_v20, %v742_v48 }
 0x199   : > { %v894_v25 = vpop.f32.mrf.mxu1 }
 0x19a   : > { %v934_v26 = vmax.f32 %v901_v24, 0.0  ;;  %v895_v23 = vadd.f32 %v894_v25, %v732_v47 }
 0x19b   : > { %v865_v29 = vpop.f32.mrf.mxu2 }
 0x19c   : > { %959 = vst.msk [vmem:[%s1796_s23 + $0x38] sm:$0xff] %vm952_vm1, %v934_v26  ;;  %v930_v18 = vmax.f32 %v895_v23, 0.0  ;;  %v866_v30 = vadd.f32 %v865_v29, %v772_v27 }
 0x19e   : > { %955 = vst.msk [vmem:[%s1796_s23 + $0x18] sm:$0xff] %vm952_vm1, %v930_v18  ;;  %v945_v32 = vmax.f32 %v866_v30, 0.0 }
 0x19f   : > { %v903_v33 = vpop.f32.mrf.mxu3 }
 0x1a0   : > { %970 = vst [vmem:[%s1796_s23 + $0x90] sm:$0xff] %v945_v32  ;;  %v904_v28 = vadd.f32 %v903_v33, %v747_v57 }
 0x1a1   : > { %v897_v16 = vpop.f32.mrf.mxu1 }
 0x1a2   : > { %v936_v34 = vmax.f32 %v904_v28, 0.0  ;;  %v898_v22 = vadd.f32 %v897_v16, %v737_v56 }
 0x1a3   : > { %v868_v36 = vpop.f32.mrf.mxu2 }
 0x1a4   : > { %961 = vst.msk [vmem:[%s1796_s23 + $0x48] sm:$0xff] %vm952_vm1, %v936_v34  ;;  %v932_v21 = vmax.f32 %v898_v22, 0.0  ;;  %v869_v35 = vadd.f32 %v868_v36, %v777_v31 }
 0x1a6   : > { %957 = vst.msk [vmem:[%s1796_s23 + $0x28] sm:$0xff] %vm952_vm1, %v932_v21  ;;  %v947_v37 = vmax.f32 %v869_v35, 0.0 }
 0x1a7   : > { %v906_v38 = vpop.f32.mrf.mxu3 }
 0x1a8   : > { %972 = vst [vmem:[%s1796_s23 + $0xa0] sm:$0xff] %v947_v37  ;;  %v907_v39 = vadd.f32 %v906_v38, %v752_v1 }
 0x1aa   : > { %v938_v40 = vmax.f32 %v907_v39, 0.0 }
 0x1ab   : > { %v871_v42 = vpop.f32.mrf.mxu2 }
 0x1ac   : > { %963 = vst.msk [vmem:[%s1796_s23 + $0x58] sm:$0xff] %vm952_vm1, %v938_v40  ;;  %v872_v43 = vadd.f32 %v871_v42, %v782_v41 }
 0x1ae   : > { %v949_v44 = vmax.f32 %v872_v43, 0.0 }
 0x1af   : > { %v909_v45 = vpop.f32.mrf.mxu3 }
 0x1b0   : > { %974 = vst [vmem:[%s1796_s23 + $0xb0] sm:$0xff] %v949_v44  ;;  %v910_v46 = vadd.f32 %v909_v45, %v757_v3 }
 0x1b2   : > { %v940_v47 = vmax.f32 %v910_v46, 0.0 }
 0x1b4   : > { %965 = vst.msk [vmem:[%s1796_s23 + $0x68] sm:$0xff] %vm952_vm1, %v940_v47 }
 0x1b7   : > { %v912_v48 = vpop.f32.mrf.mxu3 }
 0x1b8   : > { %v913_v49 = vadd.f32 %v912_v48, %v762_v7 }
 0x1ba   : > { %v942_v50 = vmax.f32 %v913_v49, 0.0 }
 0x1bc   : > { %967 = vst.msk [vmem:[%s1796_s23 + $0x78] sm:$0xff] %vm952_vm1, %v942_v50 }
 0x1bf   : > { %v915_v51 = vpop.f32.mrf.mxu3 }
 0x1c0   : > { %v916_v52 = vadd.f32 %v915_v51, %v767_v13 }
 0x1c2   : > { %v944_v53 = vmax.f32 %v916_v52, 0.0 }
 0x1c4   : > { %969 = vst.msk [vmem:[%s1796_s23 + $0x88] sm:$0xff] %vm952_vm1, %v944_v53 }
 0x1c7   : > { %v918_v54 = vpop.f32.mrf.mxu3 }
 0x1c8   : > { %v919_v56 = vadd.f32 %v918_v54, %v772_v27 }
 0x1ca   : > { %v946_v57 = vmax.f32 %v919_v56, 0.0 }
 0x1cc   : > { %971 = vst.msk [vmem:[%s1796_s23 + $0x98] sm:$0xff] %vm952_vm1, %v946_v57 }
 0x1cf   : > { %v921_v59 = vpop.f32.mrf.mxu3 }
 0x1d0   : > { %v922_v60 = vadd.f32 %v921_v59, %v777_v31 }
 0x1d2   : > { %v948_v61 = vmax.f32 %v922_v60, 0.0 }
 0x1d4   : > { %973 = vst.msk [vmem:[%s1796_s23 + $0xa8] sm:$0xff] %vm952_vm1, %v948_v61 }
 0x1d7   : > { %v924_v62 = vpop.f32.mrf.mxu3 }
 0x1d8   : > { %v925_v63 = vadd.f32 %v924_v62, %v782_v41 }
 0x1da   : > { %v950_v0 = vmax.f32 %v925_v63, 0.0 }
 0x1dc   : > { %975 = vst.msk [vmem:[%s1796_s23 + $0xb8] sm:$0xff] %vm952_vm1, %v950_v0 }
 0x1dd PF: > { %s15_s20 = sadd.s32 1, %s1211_s20   ;;  %s1850_s18 = smov %s1207_s19 }
 0x1de   : > { %p12_p5 = scmp.ge.s32.totalorder %s15_s20, 4   ;;  %s1851_s19 = smov %s1853_s21 }
 0x1e0   :  { %14 = sbr.rel (!%p12_p5) target bundleno = 2 (0x2), region = 76 }

</bundles_post_ra>
